<compile_context>
chip_gen: v5e
topology: v5e:2x2
jax: 0.10.0
libtpu: 0.0.40
codegen_flags: <defaults>
</compile_context>

<pallas_src>
import functools

import jax
import jax.numpy as jnp
from jax.experimental import pallas as pl
from jax.experimental.pallas import tpu as pltpu


# --------------------------------------------------------------------------
# In-kernel activation (matches build_activation in the PyTorch module)
# --------------------------------------------------------------------------
def _apply_act(x, act_func):
    if act_func is None or act_func == "none":
        return x
    if act_func == "relu":
        return jnp.maximum(x, 0.0)
    if act_func == "relu6":
        return jnp.clip(x, 0.0, 6.0)
    if act_func == "tanh":
        return jnp.tanh(x)
    if act_func == "sigmoid":
        return jax.nn.sigmoid(x)
    if act_func == "h_sigmoid":
        return jnp.clip(x + 3.0, 0.0, 6.0) * (1.0 / 6.0)
    if act_func == "h_swish":
        return x * jnp.clip(x + 3.0, 0.0, 6.0) * (1.0 / 6.0)
    if act_func == "swish":
        return x * jax.nn.sigmoid(x)
    raise ValueError("do not support: %s" % act_func)


# --------------------------------------------------------------------------
# Pallas kernel: fused  (act?) -> x @ W -> + b -> (act?)
# --------------------------------------------------------------------------
def _linear_kernel(x_ref, w_ref, b_ref, o_ref, *, act_func, act_before_weight):
    # x_ref: (tm, K)   w_ref: (K, N)   b_ref: (1, N)   o_ref: (tm, N)
    x = x_ref[...].astype(jnp.float32)
    if act_before_weight:
        x = _apply_act(x, act_func)
    acc = jnp.dot(x, w_ref[...], preferred_element_type=jnp.float32)
    acc = acc + b_ref[...]                       # (1, N) broadcasts over rows
    if not act_before_weight:
        acc = _apply_act(acc, act_func)
    o_ref[...] = acc.astype(o_ref.dtype)


# --------------------------------------------------------------------------
# Wrapper
# --------------------------------------------------------------------------
def linear_layer(x, weight, bias=None, *, act_func=None, ops_order="weight_bn_act"):
    """Forward of LinearLayer (default config).

    x:      (M, in_features)
    weight: (out_features, in_features)   -- PyTorch nn.Linear layout
    bias:   (out_features,) or None
    """
    M, K = x.shape
    N, Kw = weight.shape
    assert K == Kw, (K, Kw)

    ops_list = ops_order.split("_")
    act_before_weight = ops_list.index("act") < ops_list.index("weight") if "act" in ops_list else False

    # Keep weight/bias in f32 (do not quantize to activation dtype).
    w_kn = jnp.asarray(weight, jnp.float32).T                       # (K, N)
    b_1n = (jnp.zeros((1, N), jnp.float32) if bias is None
            else jnp.asarray(bias, jnp.float32).reshape(1, N))

    # Row tiling: one big resident block if it fits, else 512-row tiles.
    def _round_up(a, m):
        return ((a + m - 1) // m) * m

    if M <= 512:
        Mp = _round_up(M, 8)
        tm = Mp
    else:
        tm = 512
        Mp = _round_up(M, tm)

    x_p = x if Mp == M else jnp.pad(x, ((0, Mp - M), (0, 0)))

    kernel = functools.partial(
        _linear_kernel, act_func=act_func, act_before_weight=act_before_weight
    )

    out = pl.pallas_call(
        kernel,
        out_shape=jax.ShapeDtypeStruct((Mp, N), x.dtype),
        grid=(Mp // tm,),
        in_specs=[
            pl.BlockSpec((tm, K), lambda i: (i, 0)),   # streamed activation rows
            pl.BlockSpec((K, N), lambda i: (0, 0)),    # resident weight
            pl.BlockSpec((1, N), lambda i: (0, 0)),    # resident bias
        ],
        out_specs=pl.BlockSpec((tm, N), lambda i: (i, 0)),
        compiler_params=pltpu.CompilerParams(
            dimension_semantics=("parallel",),
        ),
    )(x_p, w_kn, b_1n)

    return out[:M]


# --------------------------------------------------------------------------
# Pure-JAX reference (for verification only)
# --------------------------------------------------------------------------
def _reference(x, weight, bias=None, *, act_func=None, ops_order="weight_bn_act"):
    ops_list = ops_order.split("_")
    act_first = "act" in ops_list and ops_list.index("act") < ops_list.index("weight")
    y = jnp.asarray(x, jnp.float32)
    if act_first:
        y = _apply_act(y, act_func)
    y = y @ jnp.asarray(weight, jnp.float32).T
    if bias is not None:
        y = y + jnp.asarray(bias, jnp.float32)
    if not act_first:
        y = _apply_act(y, act_func)
    return y.astype(x.dtype)


# --------------------------------------------------------------------------
# Main
# --------------------------------------------------------------------------
if __name__ == "__main__":
    key = jax.random.PRNGKey(0)
    k_x, k_w, k_b = jax.random.split(key, 3)

    batch, in_features, out_features = 16, 32, 64
    x = jax.random.normal(k_x, (batch, in_features), dtype=jnp.float32)
    weight = jax.random.normal(k_w, (out_features, in_features), dtype=jnp.float32) * 0.1
    bias = jax.random.normal(k_b, (out_features,), dtype=jnp.float32) * 0.1

    # Default LinearLayer config: bias=True, use_bn=False, act_func=None.
    out = linear_layer(x, weight, bias, act_func=None)
    out = jax.block_until_ready(out)
    ref = _reference(x, weight, bias, act_func=None)
    assert out.shape == ref.shape, (out.shape, ref.shape)
    assert jnp.allclose(out, ref, atol=1e-5, rtol=1e-5), "mismatch vs reference (linear)"

    # Also exercise a fused activation path (act_func='relu', default ops_order).
    out_act = jax.block_until_ready(linear_layer(x, weight, bias, act_func="relu"))
    ref_act = _reference(x, weight, bias, act_func="relu")
    assert jnp.allclose(out_act, ref_act, atol=1e-5, rtol=1e-5), "mismatch vs reference (relu)"

    # And the no-bias path.
    out_nb = jax.block_until_ready(linear_layer(x, weight, None, act_func="h_swish"))
    ref_nb = _reference(x, weight, None, act_func="h_swish")
    assert jnp.allclose(out_nb, ref_nb, atol=1e-5, rtol=1e-5), "mismatch vs reference (h_swish)"

    print("KERNEL_OK")
</pallas_src>

<mosaic_0001>
module attributes {stable_mosaic.version = 11 : i64} {
  func.func @_linear_kernel(%arg0: i32, %arg1: memref<16x32xf32, #tpu.memory_space<vmem>>, %arg2: memref<32x64xf32, #tpu.memory_space<vmem>>, %arg3: memref<1x64xf32, #tpu.memory_space<vmem>>, %arg4: memref<16x64xf32, #tpu.memory_space<vmem>>) attributes {dimension_semantics = [#tpu.dimension_semantics<parallel>], iteration_bounds = array<i64: 1>, scalar_prefetch = 0 : i64, scratch_operands = 0 : i64, tpu.core_type = #tpu.core_type<tc>, window_params = [{transform_indices = @transform_0, window_bounds = array<i64: 16, 32>}, {pipeline_mode = #tpu.pipeline_mode<synchronous>, transform_indices = @transform_1, window_bounds = array<i64: 32, 64>}, {pipeline_mode = #tpu.pipeline_mode<synchronous>, transform_indices = @transform_2, window_bounds = array<i64: 1, 64>}, {transform_indices = @transform_3, window_bounds = array<i64: 16, 64>}]} {
    %c0 = arith.constant 0 : index
    %c0_0 = arith.constant 0 : index
    %0 = vector.load %arg1[%c0, %c0_0] : memref<16x32xf32, #tpu.memory_space<vmem>>, vector<16x32xf32>
    %c0_1 = arith.constant 0 : index
    %c0_2 = arith.constant 0 : index
    %1 = vector.load %arg2[%c0_1, %c0_2] : memref<32x64xf32, #tpu.memory_space<vmem>>, vector<32x64xf32>
    %cst = arith.constant dense<0.000000e+00> : vector<16x64xf32>
    %2 = tpu.matmul %0, %1, %cst {dimension_numbers = #tpu.dot_dimension_numbers<[1], [0], [0], [1], [0, 0, 1, 1], [], []>} : vector<16x32xf32>, vector<32x64xf32>, vector<16x64xf32> -> vector<16x64xf32>
    %c0_3 = arith.constant 0 : index
    %c0_4 = arith.constant 0 : index
    %3 = vector.load %arg3[%c0_3, %c0_4] : memref<1x64xf32, #tpu.memory_space<vmem>>, vector<1x64xf32>
    %4 = vector.broadcast %3 : vector<1x64xf32> to vector<16x64xf32>
    %5 = arith.addf %2, %4 : vector<16x64xf32>
    %c0_5 = arith.constant 0 : index
    %c0_6 = arith.constant 0 : index
    %6 = vector.load %arg4[%c0_5, %c0_6] : memref<16x64xf32, #tpu.memory_space<vmem>>, vector<16x64xf32>
    tpu.vector_store %arg4[%c0_5, %c0_6], %5 {strides = array<i32>} : memref<16x64xf32, #tpu.memory_space<vmem>>, vector<16x64xf32>,
    return
  }
  func.func @transform_0(%arg0: i32) -> (i32, i32) {
    %c0_i32 = arith.constant 0 : i32
    %c0_i32_0 = arith.constant 0 : i32
    return %arg0, %c0_i32 : i32, i32
  }
  func.func @transform_1(%arg0: i32) -> (i32, i32) {
    %c0_i32 = arith.constant 0 : i32
    %c0_i32_0 = arith.constant 0 : i32
    %c0_i32_1 = arith.constant 0 : i32
    return %c0_i32, %c0_i32_0 : i32, i32
  }
  func.func @transform_2(%arg0: i32) -> (i32, i32) {
    %c0_i32 = arith.constant 0 : i32
    %c0_i32_0 = arith.constant 0 : i32
    %c0_i32_1 = arith.constant 0 : i32
    return %c0_i32, %c0_i32_0 : i32, i32
  }
  func.func @transform_3(%arg0: i32) -> (i32, i32) {
    %c0_i32 = arith.constant 0 : i32
    %c0_i32_0 = arith.constant 0 : i32
    return %arg0, %c0_i32 : i32, i32
  }
}

</mosaic_0001>

<bundles_post_ra>
// kernel: tpu_custom_call.1
= control target key start
LH: loop header
LB: loop body
LE: loop exit
PB: predicated region body
PF: predicated region fallthrough
CT: control target
= control target key end

     0   :  { %8 = vsyncpa [#allocation3], 0  ;;  %s246_s0 = inlined_call_operand.hbm [shape: f32[16,32], index: 0, kind: input, shape index: {}]   ;;  %s247_s1 = inlined_call_operand.hbm [shape: f32[32,64], index: 1, kind: input, shape index: {}]   ;;  %s248_s2 = inlined_call_operand.vmem [shape: f32[1,64], index: 2, kind: input, shape index: {}]   ;;  %s249_s3 = inlined_call_operand.hbm [shape: f32[16,64], index: 3, kind: output, shape index: {}]  }
   0x1   :  { %9 = vsyncpa [#allocation6], 0 }
   0x2   :  { %10 = vsyncpa [#allocation4], 0  ;;  %s15_s14 = sshll.u32 %s246_s0, 4  ;;  %s200_s15 = smov [#allocation2]   ;;  %s16_s14 = int_to_ptr.hbm [resolvable:$true] %s15_s14 }
   0x3   :  { %s17_s16 = sshll.u32 %s200_s15, 4  ;;  %s28_s19 = sshll.u32 %s247_s1, 4  ;;  %s18_s16 = int_to_ptr.vmem [resolvable:$true] %s17_s16  ;;  %s29_s19 = int_to_ptr.hbm [resolvable:$true] %s28_s19 }
   0x4   :  { %s201_s20 = smov 128   ;;  %s202_s21 = smov 8  }
   0x5   :  { %23 = dma.hbm_to_vmem [thread:$0]  %s16_s14, 256, %s18_s16, [#allocation3], %s201_s20, %s201_s20, %s202_s21  }
   0x6   :  { %s203_s22 = smov [#allocation5]  }
   0x7   :  { %s30_s23 = sshll.u32 %s203_s22, 4  ;;  %s31_s23 = int_to_ptr.vmem [resolvable:$true] %s30_s23 }
   0x8   :  { %36 = dma.hbm_to_vmem [thread:$0]  %s29_s19, 512, %s31_s23, [#allocation6], %s201_s20, %s201_s20, %s202_s21  }
   0x9   :  { %194 = dma.done.wait [#allocation3], 256  }
   0xa   :  { %195 = vsyncadd [#allocation3], 4294967040 }
   0xb   :  { %196 = dma.done.wait [#allocation6], 512  }
   0xc   :  { %197 = vsyncadd [#allocation6], 4294966784  ;;  %v52_v0 = vld [vmem:[#allocation5 + $0x18] sm:$0xff]  ;;  %v51_v1 = vld [vmem:[#allocation5 + $0x10] sm:$0xff]  ;;  %vm57_vm0 = vcmask 261120   ;;  %s204_s24 = smov [#allocation7]  }
   0xd   :  { %76 = vmatpush.msra.mxu0 %v52_v0  ;;  %112 = vmatpush.msra.mxu1 %v52_v0  ;;  %v50_v2 = vld [vmem:[#allocation5 + $0x8] sm:$0xff]  ;;  %v49_v3 = vld [vmem:[#allocation5] sm:$0xff]  ;;  %v47_v4 = vld [vmem:[#allocation2] sm:$0xff]  ;;  %s94_s25 = sshll.u32 %s204_s24, 4  ;;  %s96_s28 = sshll.u32 %s249_s3, 4  ;;  %vm87_vm1 = vcmask 523264   ;;  %s95_s25 = int_to_ptr.vmem [resolvable:$true] %s94_s25  ;;  %s97_s28 = int_to_ptr.hbm [resolvable:$true] %s96_s28 }
   0xe   :  { %v48_v5 = vld [vmem:[#allocation2 + $0x8] sm:$0xff]  ;;  %v121_v6 = vld [vmem:[%s248_s2] ss:$0 sm:$0xff] }
   0xf   :  { %77 = vmatpush.msra.mxu0 %v51_v1  ;;  %113 = vmatpush.msra.mxu1 %v51_v1 }
  0x11   :  { %78 = vmatpush.msra.mxu0 %v50_v2  ;;  %114 = vmatpush.msra.mxu1 %v50_v2 }
  0x13   :  { %79 = vmatpush.msra.mxu0 %v49_v3  ;;  %115 = vmatpush.msra.mxu1 %v49_v3 }
  0x14   :  { %110 = vmatmul.msk.f32.vlgmr.msra.gmra.mxu0 %vm57_vm0, %v47_v4  ;;  %111 = vmatmul.msk.f32.vlgmr.msra.gmra.mxu1 %vm57_vm0, %v48_v5 }
  0x91   :  { %v81_v7 = vpop.f32.mrf.mxu0  ;;  %v84_v8 = vpop.f32.mrf.mxu1 }
  0x92   :  { %v82_v9 = vadd.f32 %v121_v6, %v81_v7  ;;  %v85_v10 = vadd.f32 %v121_v6, %v84_v8 }
  0x94   :  { %88 = vst.msk [vmem:[#allocation7] sm:$0xff] %vm87_vm1, %v82_v9 }
  0x95   :  { %89 = vst.msk [vmem:[#allocation7 + $0x8] sm:$0xff] %vm87_vm1, %v85_v10 }
  0x96   :  { %102 = dma.vmem_to_hbm [thread:$0]  %s95_s25, 256, %s97_s28, [#allocation4], %s201_s20, %s201_s20, %s202_s21  }
  0x97   :  { %198 = dma.done.wait [#allocation4], 256  }
  0x98   :  { %199 = vsyncadd [#allocation4], 4294967040 }
  0x99   :  { %107 = vsyncpa [#allocation3], 1 }
  0x9a   :  { %108 = vsyncpa [#allocation6], 1 }
  0x9b   :  { %109 = vsyncpa [#allocation4], 1 }

</bundles_post_ra>
